<compile_context>
chip_gen: v7x
topology: tpu7x:2x2x1
jax: 0.10.0
libtpu: 0.0.40
codegen_flags: <defaults>
</compile_context>

<pallas_src>
import functools

import numpy as np

import jax
import jax.numpy as jnp
from jax import lax
from jax.experimental import pallas as pl
from jax.experimental.pallas import tpu as pltpu


def _enhence_kernel(x_ref, w1_ref, b1_ref, w3_ref, b3_ref, m_ref, o_ref, *, H, W):
    HW = H * W
    C4 = o_ref.shape[0]

    x = x_ref[...]                                            # (4*C4, HW)

    # ---- conv1 (1x1) on all 4 chunks at once (block-diag weight) + ReLU ----
    h = jnp.dot(w1_ref[...], x, preferred_element_type=jnp.float32)
    h = jnp.maximum(h + b1_ref[...], 0.0).astype(x.dtype)     # (4*C4, HW)

    # ---- conv3 (3x3, padding=1): 9 shifted taps via lane rolls + precomputed
    # boundary masks, folded into a single fused matmul over K = 9*4*C4. ----
    taps = []
    r = 0
    for kh in range(3):
        for kw in range(3):
            dy, dx = kh - 1, kw - 1
            s = dy * W + dx                                   # flat-index shift
            if s == 0:
                taps.append(h)
                continue
            hs = pltpu.roll(h, shift=(-s) % HW, axis=1)       # XLU, ~free slot
            hs = hs * m_ref[r:r + 1, :]                       # zero out-of-image reads
            r += 1
            taps.append(hs)
    shifted = jnp.concatenate(taps, axis=0)                   # (9*4*C4, HW)

    y = jnp.dot(w3_ref[...], shifted,
                preferred_element_type=jnp.float32) + b3_ref[...]   # (4*C4, HW)

    # ---- elementwise max over the 4 chunks, one lane-dense store ----
    out = jnp.maximum(jnp.maximum(y[0 * C4:1 * C4, :], y[1 * C4:2 * C4, :]),
                      jnp.maximum(y[2 * C4:3 * C4, :], y[3 * C4:4 * C4, :]))
    o_ref[...] = out.astype(o_ref.dtype)


def _boundary_masks(H, W, dtype):
    """Precompute the 8 per-tap boundary masks (center tap needs none)."""
    HW = H * W
    ys, xs = np.divmod(np.arange(HW, dtype=np.int64), W)
    rows = []
    for kh in range(3):
        for kw in range(3):
            dy, dx = kh - 1, kw - 1
            if dy == 0 and dx == 0:
                continue
            ok = ((ys + dy >= 0) & (ys + dy < H) &
                  (xs + dx >= 0) & (xs + dx < W))
            rows.append(ok.astype(np.float32))
    return jnp.asarray(np.stack(rows, axis=0), dtype=dtype)   # (8, HW)


def enhence_forward(x_nchw, w1, b1, w3, b3):
    """EnhenceModule forward.

    x_nchw : [B, C, H, W]       (C divisible by 4)
    w1     : [C4, C4]           PyTorch conv1 weight (out, in), from (out,in,1,1)
    b1     : [C4]
    w3     : [C4, C4, 3, 3]     PyTorch conv3 weight (out, in, kH, kW)  (OIHW)
    b3     : [C4]
    returns [B, C4, H, W]
    """
    B, C, H, W = x_nchw.shape
    C4 = C // 4
    HW = H * W
    dt = x_nchw.dtype

    # Free reshape only (no transpose): channels stay major, spatial flattens
    # onto the lane axis.
    x3 = x_nchw.reshape(B, C, HW)

    # Block-diagonal weights so all 4 chunks share one matmul; the 9 conv3
    # taps are folded along the contraction axis (tap-major columns, matching
    # the kernel's (kh, kw) loop order).
    eye4 = jnp.eye(4, dtype=dt)
    w1bd = jnp.kron(eye4, w1.astype(dt))                           # (C, C)
    w3f = jnp.concatenate(
        [jnp.kron(eye4, w3[:, :, kh, kw].astype(dt))
         for kh in range(3) for kw in range(3)], axis=1)           # (C, 9*C)
    b1c = jnp.tile(b1.astype(dt), 4).reshape(C, 1)
    b3c = jnp.tile(b3.astype(dt), 4).reshape(C, 1)
    masks = _boundary_masks(H, W, dt)                              # (8, HW)

    kernel = functools.partial(_enhence_kernel, H=H, W=W)

    out = pl.pallas_call(
        kernel,
        out_shape=jax.ShapeDtypeStruct((B, C4, HW), dt),
        grid=(B,),
        in_specs=[
            pl.BlockSpec((None, C, HW), lambda b: (b, 0, 0)),
            pl.BlockSpec((C, C), lambda b: (0, 0)),
            pl.BlockSpec((C, 1), lambda b: (0, 0)),
            pl.BlockSpec((C, 9 * C), lambda b: (0, 0)),
            pl.BlockSpec((C, 1), lambda b: (0, 0)),
            pl.BlockSpec((8, HW), lambda b: (0, 0)),
        ],
        out_specs=pl.BlockSpec((None, C4, HW), lambda b: (b, 0, 0)),
        compiler_params=pltpu.CompilerParams(
            dimension_semantics=("parallel",)),
    )(x3, w1bd, b1c, w3f, b3c, masks)

    # Free reshape back to NCHW.
    return out.reshape(B, C4, H, W)


def enhence_reference(x_nchw, w1, b1, w3, b3):
    """Pure-JAX reference mirroring the PyTorch module (OIHW weights)."""
    B, C, H, W = x_nchw.shape
    C4 = C // 4
    outs = []
    for c in range(4):
        xc = x_nchw[:, c * C4:(c + 1) * C4]
        h = jnp.einsum('oi,bihw->bohw', w1, xc) + b1[None, :, None, None]
        h = jnp.maximum(h, 0.0)
        y = lax.conv_general_dilated(
            h, w3, window_strides=(1, 1), padding='SAME',
            dimension_numbers=('NCHW', 'OIHW', 'NCHW'))
        outs.append(y + b3[None, :, None, None])
    return jnp.max(jnp.stack(outs, axis=1), axis=1)


if __name__ == "__main__":
    key = jax.random.PRNGKey(0)
    k_x, k_w1, k_b1, k_w3, k_b3 = jax.random.split(key, 5)

    B, C, H, W = 2, 16, 16, 16          # in_channel = 16 -> C4 = 4 per chunk
    C4 = C // 4

    x = jax.random.normal(k_x, (B, C, H, W), dtype=jnp.float32)
    # PyTorch-native layouts: conv1 weight (out, in), conv3 weight OIHW.
    w1 = 0.2 * jax.random.normal(k_w1, (C4, C4), dtype=jnp.float32)
    b1 = 0.1 * jax.random.normal(k_b1, (C4,), dtype=jnp.float32)
    w3 = 0.2 * jax.random.normal(k_w3, (C4, C4, 3, 3), dtype=jnp.float32)
    b3 = 0.1 * jax.random.normal(k_b3, (C4,), dtype=jnp.float32)

    out = enhence_forward(x, w1, b1, w3, b3)
    out = jax.block_until_ready(out)

    ref = enhence_reference(x, w1, b1, w3, b3)
    assert out.shape == (B, C4, H, W), out.shape
    assert jnp.allclose(out, ref, atol=1e-4, rtol=1e-4), "mismatch vs reference"

    print("KERNEL_OK")
</pallas_src>

<mosaic_0001>
module attributes {stable_mosaic.version = 11 : i64} {
  func.func @_enhence_kernel(%arg0: i32, %arg1: memref<1x16x256xf32, #tpu.memory_space<vmem>>, %arg2: memref<16x16xf32, #tpu.memory_space<vmem>>, %arg3: memref<16x1xf32, #tpu.memory_space<vmem>>, %arg4: memref<16x144xf32, #tpu.memory_space<vmem>>, %arg5: memref<16x1xf32, #tpu.memory_space<vmem>>, %arg6: memref<8x256xf32, #tpu.memory_space<vmem>>, %arg7: memref<1x4x256xf32, #tpu.memory_space<vmem>>) attributes {dimension_semantics = [#tpu.dimension_semantics<parallel>], iteration_bounds = array<i64: 2>, scalar_prefetch = 0 : i64, scratch_operands = 0 : i64, tpu.core_type = #tpu.core_type<tc>, window_params = [{transform_indices = @transform_0, window_bounds = array<i64: 1, 16, 256>}, {pipeline_mode = #tpu.pipeline_mode<synchronous>, transform_indices = @transform_1, window_bounds = array<i64: 16, 16>}, {pipeline_mode = #tpu.pipeline_mode<synchronous>, transform_indices = @transform_2, window_bounds = array<i64: 16, 1>}, {pipeline_mode = #tpu.pipeline_mode<synchronous>, transform_indices = @transform_3, window_bounds = array<i64: 16, 144>}, {pipeline_mode = #tpu.pipeline_mode<synchronous>, transform_indices = @transform_4, window_bounds = array<i64: 16, 1>}, {pipeline_mode = #tpu.pipeline_mode<synchronous>, transform_indices = @transform_5, window_bounds = array<i64: 8, 256>}, {transform_indices = @transform_6, window_bounds = array<i64: 1, 4, 256>}]} {
    %c0 = arith.constant 0 : index
    %c0_0 = arith.constant 0 : index
    %c0_1 = arith.constant 0 : index
    %0 = vector.load %arg1[%c0, %c0_0, %c0_1] : memref<1x16x256xf32, #tpu.memory_space<vmem>>, vector<1x16x256xf32>
    %1 = vector.shape_cast %0 : vector<1x16x256xf32> to vector<16x256xf32>
    %c0_2 = arith.constant 0 : index
    %c0_3 = arith.constant 0 : index
    %2 = vector.load %arg2[%c0_2, %c0_3] : memref<16x16xf32, #tpu.memory_space<vmem>>, vector<16x16xf32>
    %cst = arith.constant dense<0.000000e+00> : vector<16x256xf32>
    %3 = tpu.matmul %2, %1, %cst {dimension_numbers = #tpu.dot_dimension_numbers<[1], [0], [0], [1], [0, 0, 1, 1], [], []>} : vector<16x16xf32>, vector<16x256xf32>, vector<16x256xf32> -> vector<16x256xf32>
    %c0_4 = arith.constant 0 : index
    %c0_5 = arith.constant 0 : index
    %4 = vector.load %arg3[%c0_4, %c0_5] : memref<16x1xf32, #tpu.memory_space<vmem>>, vector<16x1xf32>
    %5 = vector.broadcast %4 : vector<16x1xf32> to vector<16x256xf32>
    %6 = arith.addf %3, %5 : vector<16x256xf32>
    %cst_6 = arith.constant 0.000000e+00 : f32
    %7 = vector.broadcast %cst_6 : f32 to vector<16x256xf32>
    %8 = arith.maximumf %6, %7 : vector<16x256xf32>
    %c17_i32 = arith.constant 17 : i32
    %9 = tpu.dynamic_rotate %8 by %c17_i32 dim 1 : vector<16x256xf32>, i32 -> vector<16x256xf32>
    %c0_7 = arith.constant 0 : index
    %c0_8 = arith.constant 0 : index
    %10 = vector.load %arg6[%c0_7, %c0_8] : memref<8x256xf32, #tpu.memory_space<vmem>>, vector<1x256xf32>
    %11 = vector.broadcast %10 : vector<1x256xf32> to vector<16x256xf32>
    %12 = arith.mulf %9, %11 : vector<16x256xf32>
    %c16_i32 = arith.constant 16 : i32
    %13 = tpu.dynamic_rotate %8 by %c16_i32 dim 1 : vector<16x256xf32>, i32 -> vector<16x256xf32>
    %c1 = arith.constant 1 : index
    %c0_9 = arith.constant 0 : index
    %14 = vector.load %arg6[%c1, %c0_9] : memref<8x256xf32, #tpu.memory_space<vmem>>, vector<1x256xf32>
    %15 = vector.broadcast %14 : vector<1x256xf32> to vector<16x256xf32>
    %16 = arith.mulf %13, %15 : vector<16x256xf32>
    %c15_i32 = arith.constant 15 : i32
    %17 = tpu.dynamic_rotate %8 by %c15_i32 dim 1 : vector<16x256xf32>, i32 -> vector<16x256xf32>
    %c2 = arith.constant 2 : index
    %c0_10 = arith.constant 0 : index
    %18 = vector.load %arg6[%c2, %c0_10] : memref<8x256xf32, #tpu.memory_space<vmem>>, vector<1x256xf32>
    %19 = vector.broadcast %18 : vector<1x256xf32> to vector<16x256xf32>
    %20 = arith.mulf %17, %19 : vector<16x256xf32>
    %c1_i32 = arith.constant 1 : i32
    %21 = tpu.dynamic_rotate %8 by %c1_i32 dim 1 : vector<16x256xf32>, i32 -> vector<16x256xf32>
    %c3 = arith.constant 3 : index
    %c0_11 = arith.constant 0 : index
    %22 = vector.load %arg6[%c3, %c0_11] : memref<8x256xf32, #tpu.memory_space<vmem>>, vector<1x256xf32>
    %23 = vector.broadcast %22 : vector<1x256xf32> to vector<16x256xf32>
    %24 = arith.mulf %21, %23 : vector<16x256xf32>
    %c255_i32 = arith.constant 255 : i32
    %25 = tpu.dynamic_rotate %8 by %c255_i32 dim 1 : vector<16x256xf32>, i32 -> vector<16x256xf32>
    %c4 = arith.constant 4 : index
    %c0_12 = arith.constant 0 : index
    %26 = vector.load %arg6[%c4, %c0_12] : memref<8x256xf32, #tpu.memory_space<vmem>>, vector<1x256xf32>
    %27 = vector.broadcast %26 : vector<1x256xf32> to vector<16x256xf32>
    %28 = arith.mulf %25, %27 : vector<16x256xf32>
    %c241_i32 = arith.constant 241 : i32
    %29 = tpu.dynamic_rotate %8 by %c241_i32 dim 1 : vector<16x256xf32>, i32 -> vector<16x256xf32>
    %c5 = arith.constant 5 : index
    %c0_13 = arith.constant 0 : index
    %30 = vector.load %arg6[%c5, %c0_13] : memref<8x256xf32, #tpu.memory_space<vmem>>, vector<1x256xf32>
    %31 = vector.broadcast %30 : vector<1x256xf32> to vector<16x256xf32>
    %32 = arith.mulf %29, %31 : vector<16x256xf32>
    %c240_i32 = arith.constant 240 : i32
    %33 = tpu.dynamic_rotate %8 by %c240_i32 dim 1 : vector<16x256xf32>, i32 -> vector<16x256xf32>
    %c6 = arith.constant 6 : index
    %c0_14 = arith.constant 0 : index
    %34 = vector.load %arg6[%c6, %c0_14] : memref<8x256xf32, #tpu.memory_space<vmem>>, vector<1x256xf32>
    %35 = vector.broadcast %34 : vector<1x256xf32> to vector<16x256xf32>
    %36 = arith.mulf %33, %35 : vector<16x256xf32>
    %c239_i32 = arith.constant 239 : i32
    %37 = tpu.dynamic_rotate %8 by %c239_i32 dim 1 : vector<16x256xf32>, i32 -> vector<16x256xf32>
    %c7 = arith.constant 7 : index
    %c0_15 = arith.constant 0 : index
    %38 = vector.load %arg6[%c7, %c0_15] : memref<8x256xf32, #tpu.memory_space<vmem>>, vector<1x256xf32>
    %39 = vector.broadcast %38 : vector<1x256xf32> to vector<16x256xf32>
    %40 = arith.mulf %37, %39 : vector<16x256xf32>
    %41 = tpu.concatenate %12, %16, %20, %24, %8, %28, %32, %36, %40 in 0 : vector<16x256xf32>, vector<16x256xf32>, vector<16x256xf32>, vector<16x256xf32>, vector<16x256xf32>, vector<16x256xf32>, vector<16x256xf32>, vector<16x256xf32>, vector<16x256xf32> -> vector<144x256xf32>
    %c0_16 = arith.constant 0 : index
    %c0_17 = arith.constant 0 : index
    %42 = vector.load %arg4[%c0_16, %c0_17] : memref<16x144xf32, #tpu.memory_space<vmem>>, vector<16x144xf32>
    %cst_18 = arith.constant dense<0.000000e+00> : vector<16x256xf32>
    %43 = tpu.matmul %42, %41, %cst_18 {dimension_numbers = #tpu.dot_dimension_numbers<[1], [0], [0], [1], [0, 0, 1, 1], [], []>} : vector<16x144xf32>, vector<144x256xf32>, vector<16x256xf32> -> vector<16x256xf32>
    %c0_19 = arith.constant 0 : index
    %c0_20 = arith.constant 0 : index
    %44 = vector.load %arg5[%c0_19, %c0_20] : memref<16x1xf32, #tpu.memory_space<vmem>>, vector<16x1xf32>
    %45 = vector.broadcast %44 : vector<16x1xf32> to vector<16x256xf32>
    %46 = arith.addf %43, %45 : vector<16x256xf32>
    %47 = vector.extract_strided_slice %46 {offsets = [0, 0], sizes = [4, 256], strides = [1, 1]} : vector<16x256xf32> to vector<4x256xf32>
    %48 = vector.extract_strided_slice %46 {offsets = [4, 0], sizes = [4, 256], strides = [1, 1]} : vector<16x256xf32> to vector<4x256xf32>
    %49 = arith.maximumf %47, %48 : vector<4x256xf32>
    %50 = vector.extract_strided_slice %46 {offsets = [8, 0], sizes = [4, 256], strides = [1, 1]} : vector<16x256xf32> to vector<4x256xf32>
    %51 = vector.extract_strided_slice %46 {offsets = [12, 0], sizes = [4, 256], strides = [1, 1]} : vector<16x256xf32> to vector<4x256xf32>
    %52 = arith.maximumf %50, %51 : vector<4x256xf32>
    %53 = arith.maximumf %49, %52 : vector<4x256xf32>
    %c0_21 = arith.constant 0 : index
    %c0_22 = arith.constant 0 : index
    %c0_23 = arith.constant 0 : index
    %54 = vector.load %arg7[%c0_21, %c0_22, %c0_23] : memref<1x4x256xf32, #tpu.memory_space<vmem>>, vector<1x4x256xf32>
    %55 = vector.shape_cast %54 : vector<1x4x256xf32> to vector<4x256xf32>
    %56 = vector.shape_cast %53 : vector<4x256xf32> to vector<1x4x256xf32>
    tpu.vector_store %arg7[%c0_21, %c0_22, %c0_23], %56 {strides = array<i32>} : memref<1x4x256xf32, #tpu.memory_space<vmem>>, vector<1x4x256xf32>,
    return
  }
  func.func @transform_0(%arg0: i32) -> (i32, i32, i32) {
    %c0_i32 = arith.constant 0 : i32
    %c0_i32_0 = arith.constant 0 : i32
    %c0_i32_1 = arith.constant 0 : i32
    return %arg0, %c0_i32, %c0_i32_0 : i32, i32, i32
  }
  func.func @transform_1(%arg0: i32) -> (i32, i32) {
    %c0_i32 = arith.constant 0 : i32
    %c0_i32_0 = arith.constant 0 : i32
    %c0_i32_1 = arith.constant 0 : i32
    return %c0_i32, %c0_i32_0 : i32, i32
  }
  func.func @transform_2(%arg0: i32) -> (i32, i32) {
    %c0_i32 = arith.constant 0 : i32
    %c0_i32_0 = arith.constant 0 : i32
    %c0_i32_1 = arith.constant 0 : i32
    return %c0_i32, %c0_i32_0 : i32, i32
  }
  func.func @transform_3(%arg0: i32) -> (i32, i32) {
    %c0_i32 = arith.constant 0 : i32
    %c0_i32_0 = arith.constant 0 : i32
    %c0_i32_1 = arith.constant 0 : i32
    return %c0_i32, %c0_i32_0 : i32, i32
  }
  func.func @transform_4(%arg0: i32) -> (i32, i32) {
    %c0_i32 = arith.constant 0 : i32
    %c0_i32_0 = arith.constant 0 : i32
    %c0_i32_1 = arith.constant 0 : i32
    return %c0_i32, %c0_i32_0 : i32, i32
  }
  func.func @transform_5(%arg0: i32) -> (i32, i32) {
    %c0_i32 = arith.constant 0 : i32
    %c0_i32_0 = arith.constant 0 : i32
    %c0_i32_1 = arith.constant 0 : i32
    return %c0_i32, %c0_i32_0 : i32, i32
  }
  func.func @transform_6(%arg0: i32) -> (i32, i32, i32) {
    %c0_i32 = arith.constant 0 : i32
    %c0_i32_0 = arith.constant 0 : i32
    %c0_i32_1 = arith.constant 0 : i32
    return %arg0, %c0_i32, %c0_i32_0 : i32, i32, i32
  }
}

</mosaic_0001>

<bundles_post_ra>
// kernel: tpu_custom_call.1
= control target key start
LH: loop header
LB: loop body
LE: loop exit
PB: predicated region body
PF: predicated region fallthrough
CT: control target
= control target key end

     0   :  { %11 = vsyncpa [#allocation3], 0  ;;  %s1605_s0 = inlined_call_operand.hbm [shape: f32[2,16,256], index: 0, kind: input, shape index: {}]   ;;  %s1606_s1 = inlined_call_operand.hbm [shape: f32[16,16], index: 1, kind: input, shape index: {}]   ;;  %s1607_s2 = inlined_call_operand.vmem [shape: f32[16,1], index: 2, kind: input, shape index: {}]   ;;  %s1608_s3 = inlined_call_operand.vmem [shape: f32[16,144], index: 3, kind: input, shape index: {}]   ;;  %s1609_s4 = inlined_call_operand.vmem [shape: f32[16,1], index: 4, kind: input, shape index: {}]   ;;  %s1610_s5 = inlined_call_operand.vmem [shape: f32[8,256], index: 5, kind: input, shape index: {}]   ;;  %s1611_s6 = inlined_call_operand.hbm [shape: f32[2,4,256], index: 6, kind: output, shape index: {}]  }
   0x1   :  { %13 = vsyncpa [#allocation3 + $0x1], 0 }
   0x2   :  { %14 = vsyncpa [#allocation6], 0 }
   0x3   :  { %15 = vsyncpa [#allocation4], 0 }
   0x4   :  { %17 = vsyncpa [#allocation4 + $0x1], 0  ;;  %s1173_s21 = smov 0   ;;  %s1175_s22 = smov 0  }
   0x5   :  { %s1177_s23 = smov 0   ;;  %s1179_s24 = smov 0  }
   0x6 LB: > { %s1194_s25 = sadd.s32 4294967295, %s1119_s24   ;;  %s849_s26 = sadd.s32 4294967294, %s1119_s24   ;;  %s1119_s24 = sphi %s1179_s24, %s1631_s24   ;;  %s1115_s23 = sphi %s1177_s23, %s1630_s23   ;;  %s1111_s22 = sphi %s1175_s22, %s1629_s22   ;;  %s1107_s21 = sphi %s1173_s21, %s1628_s21  }
   0x7   : > { %p43_p0 = scmp.ne.s32.totalorder %s1111_s22, %s1107_s21  ;;  %p1612_p1 = scmp.eq.s32.totalorder %s1194_s25, 0 }
   0x8   : > { %p178_p3 = scmp.eq.s32.totalorder %s849_s26, 1  ;;  %p850_p5 = scmp.ge.s32.totalorder %s1119_s24, 1 }
   0x9   : > { %p1203_p4 = por %p1612_p1, %p43_p0  ;;  %p185_p7 = scmp.lt.s32.totalorder %s1119_s24, 3 }
   0xa   : > { %p1208_p6 = por %p178_p3, %p43_p0  ;;  %s1121_s30 = smov [#allocation5]  }
   0xb   : > { %s1615_s27 = scalar_select %p1203_p4, 1, 0 }
   0xc   : > { %s1616_s28 = scalar_select %p1208_p6, 1, 0 }
   0xd   : > { %p1213_p8 = pnand %p850_p5, %p185_p7  ;;  %s197_s7 = sshll.u32 %s1121_s30, 4  ;;  %s1217_s7 = int_to_ptr.vmem [resolvable:$true] %s197_s7 }
   0xe   : > { %s1229_s9 = sadd.s32 1, %s1119_s24   ;;  %s30_s10 = sadd.s32 1, %s1115_s23 }
   0xf   : > { %s1617_s29 = scalar_select %p1213_p8, 1, 0 }
  0x10   : > { %p926_p9 = pneg %p1213_p8  ;;  %s27_s11 = ssub.s32 %s1119_s24, %s1229_s9 }
  0x11   : > { %s991_s14 = scalar_lea.hbm %s1606_s1, 256 }
  0x12   : > { %p1224_p11 = pnand %p926_p9, %p1612_p1  ;;  %p992_p12 = scmp.ne.s32.totalorder %s1606_s1, %s991_s14 }
  0x13   : > { %p998_p5 = scmp.lt.u32.totalorder %s991_s14, %s1606_s1 }
  0x14   : > { %p993_p13 = pneg %p1224_p11 }
  0x16   : > { %p994_p0 = pnand %p993_p13, %p992_p12 }
  0x18   : > { %p995_p3 = pneg %p994_p0 }
  0x1a   : > { %p1000_p7 = pnand %p998_p5, %p995_p3 }
  0x1c   : > { %1003 = shalt.err (!%p1000_p7)
}
  0x1d   : > { %s1004_s19 = scalar_lea.vmem %s1217_s7, 256  ;;  %p1012_p2 = scmp.lt.s32.totalorder %s1217_s7, %s1217_s7 }
  0x1e   : > { %p1005_p9 = scmp.ne.s32.totalorder %s1217_s7, %s1004_s19  ;;  %p1013_p6 = scmp.lt.s32.totalorder %s1004_s19, %s1004_s19 }
  0x20   : > { %p1007_p10 = pnand %p1005_p9, %p993_p13  ;;  %p1014_p4 = por %p1013_p6, %p1012_p2 }
  0x22   : > { %p1008_p1 = pneg %p1007_p10 }
  0x24   : > { %p1015_p8 = pnand %p1014_p4, %p1008_p1 }
  0x26   : > { %1018 = shalt.err (!%p1015_p8)
}
  0x27   : > { %s1122_s20 = smov 128   ;;  %s1123_s26 = smov 8  }
  0x28   : > { %929 = dma.hbm_to_vmem [thread:$0]  (!%p1224_p11), %s1606_s1, 256, %s1217_s7, [#allocation6], %s1122_s20, %s1122_s20, %s1123_s26  }
  0x29   : > { %p28_p2 = scmp.eq.s32.totalorder %s27_s11, 0  ;;  %p37_p1 = scmp.ne.s32.totalorder %s1115_s23, %s1111_s22 }
  0x2a   : > { %p38_p4 = scmp.eq.s32.totalorder %s1119_s24, 0  ;;  %p939_p6 = scmp.lt.s32.totalorder %s1119_s24, 2 }
  0x2b   : > { %s1260_s13 = scalar_select %p28_p2, %s1115_s23, %s30_s10  }
  0x2c   : > { %p39_p8 = por %p38_p4, %p37_p1  ;;  %p1619_p10 = scmp.eq.s32.totalorder %s1194_s25, 1 }
  0x2d   : > { %s223_s15 = sand.u32 1, %s1115_s23   ;;  %s876_s16 = sshll.u32 %s1119_s24, 9 }
  0x2e   : > { %p1264_p12 = por %p1619_p10, %p37_p1  ;;  %s853_s17 = sshll.u32 %s223_s15, 5 }
  0x2f   : > { %s1273_s19 = scalar_lea.hbm %s1605_s0, %s876_s16  ;;  %s227_s7 = scalar_lea.vmem [#allocation2], %s853_s17 }
  0x30   : > { %s234_s10 = sshll.u32 %s227_s7, 4  ;;  %p1275_p11 = pnand %p939_p6, %p39_p8  ;;  %s1279_s10 = int_to_ptr.vmem [resolvable:$true] %s234_s10 }
  0x31   : > { %s1281_s20 = scalar_lea.sflag [#allocation3], %s223_s15  ;;  %s1019_s26 = scalar_lea.hbm %s1273_s19, 512 }
  0x32   : > { %p1020_p13 = scmp.ne.s32.totalorder %s1273_s19, %s1019_s26  ;;  %p1021_p0 = pneg %p1275_p11 }
  0x33   : > { %s1024_s16 = scalar_lea.hbm %s1605_s0, 1024  ;;  %p1025_p7 = scmp.lt.u32.totalorder %s1273_s19, %s1605_s0 }
  0x34   : > { %p1022_p3 = pnand %p1021_p0, %p1020_p13  ;;  %p1026_p9 = scmp.lt.u32.totalorder %s1024_s16, %s1019_s26 }
  0x35   : > { %p1028_p1 = scmp.lt.u32.totalorder %s1019_s26, %s1273_s19 }
  0x36   : > { %p1023_p5 = pneg %p1022_p3  ;;  %p1027_p2 = por %p1026_p9, %p1025_p7 }
  0x38   : > { %p1029_p4 = por %p1028_p1, %p1027_p2 }
  0x3a   : > { %p1030_p6 = pnand %p1029_p4, %p1023_p5 }
  0x3c   : > { %1033 = shalt.err (!%p1030_p6)
}
  0x3d   : > { %s1034_s15 = scalar_lea.vmem %s1279_s10, 512  ;;  %s1124_s18 = smov [#allocation2]  }
  0x3e   : > { %p1035_p8 = scmp.ne.s32.totalorder %s1279_s10, %s1034_s15  ;;  %s1039_s7 = sshll.u32 %s1124_s18, 4  ;;  %s1040_s7 = int_to_ptr.vmem [resolvable:$false] %s1039_s7 }
  0x3f   : > { %s1041_s30 = scalar_lea.vmem %s1040_s7, 1024  ;;  %p1042_p3 = scmp.lt.s32.totalorder %s1279_s10, %s1040_s7 }
  0x40   : > { %p1037_p10 = pnand %p1035_p8, %p1021_p0  ;;  %p1043_p7 = scmp.lt.s32.totalorder %s1041_s30, %s1034_s15 }
  0x42   : > { %p1038_p13 = pneg %p1037_p10  ;;  %p1044_p9 = por %p1043_p7, %p1042_p3 }
  0x44   : > { %p1045_p2 = pnand %p1044_p9, %p1038_p13 }
  0x46   : > { %1048 = shalt.err (!%p1045_p2)
}
  0x47   : > { %s1125_s26 = smov 256   ;;  %s1126_s12 = smov 16  }
  0x48   : > { %933 = dma.hbm_to_vmem [thread:$0]  (!%p1275_p11), %s1273_s19, 512, %s1279_s10, %s1281_s20, %s1125_s26, %s1125_s26, %s1126_s12  }
  0x49   : > { %p1622_p0 = scmp.ne.s32.totalorder %s1617_s29, 0 }
  0x4a   : > { %s1312_s16 = sand.u32 (!%p1622_p0), 1, %s1111_s22   ;;  %p1623_p5 = scmp.ne.s32.totalorder (!%p1622_p0), %s1615_s27, 0 }
  0x4b   : > { %246 = sbr.rel (%p1622_p0) target bundleno = 738 (0x2e2), region = 44  ;;  %s857_s17 = sshll.u32 (!%p1622_p0), %s1312_s16, 5 }
  0x4c   : > { %s249_s8 = scalar_lea.sflag (!%p1622_p0), [#allocation3], %s1312_s16  ;;  %s252_s15 = scalar_lea.vmem (!%p1622_p0), [#allocation2], %s857_s17 }
  0x52   : > { %1094 = dma.done.wait (%p1623_p5), %s249_s8, 512  }
  0x53   : > { %1096 = vsyncadd (%p1623_p5), %s249_s8, 4294966784  ;;  %p1624_p1 = scmp.eq.s32.totalorder %s1194_s25, 0 }
  0x55   : > { %1098 = dma.done.wait (%p1624_p1), [#allocation6], 256   ;;  %p1625_p11 = pmov %p1624_p1 }
  0x56   : > { %v1127_v0 = vmov 0.0   ;;  %v1128_v1 = vmov 0   ;;  %v286_v2 = vld [vmem:[%s252_s15 + $0x8] sm:$0xff]  ;;  %v288_v3 = vld [vmem:[%s252_s15 + $0x18] sm:$0xff]  ;;  %v285_v4 = vld [vmem:[%s252_s15] sm:$0xff]  ;;  %vm303_vm0 = vcmask 130048   ;;  %v399_v41 = vlaneseq }
  0x57   : > { %1100 = vsyncadd (%p1625_p11), [#allocation6], 4294967040  ;;  %374 = vmatprep.mubr.f32.mxu0 %v1127_v0  ;;  %989 = vset.pattern.permute.xlu0 %v1128_v1  ;;  %v878_v5 = vpack.c.bf16 %v288_v3, %v286_v2  ;;  %v287_v6 = vld [vmem:[%s252_s15 + $0x10] sm:$0xff]  ;;  %v291_v8 = vld [vmem:[%s1607_s2] sm:$0xff]  ;;  %s1129_s11 = smov 16   ;;  %s1130_s20 = smov 17  }
  0x58   : > { %990 = vset.pattern.permute.xlu1 %v1128_v1  ;;  %v880_v7 = vpack.c.bf16 %v287_v6, %v285_v4  ;;  %295 = vperm.xlu0 %989, %v291_v8   ;;  %v289_v9 = vld [vmem:[#allocation5] sm:$0xff]  ;;  %v292_v10 = vld [vmem:[%s1607_s2 + $0x8] sm:$0xff]  ;;  %s1131_s18 = smov 15   ;;  %s1132_s7 = smov 1   ;;  %v409_v44 = vshrl.u32 %v399_v41, 7  ;;  %v1402_v45 = vand.u32 127, %v399_v41 }
  0x59   : > { %879 = vmatprep.subr.bf16.mxu0 %v878_v5  ;;  %v290_v11 = vld [vmem:[#allocation5 + $0x8] sm:$0xff]  ;;  %s1133_s30 = smov 127   ;;  %s1134_s26 = smov 113   ;;  %v636_v28 = vld [vmem:[%s1609_s4] sm:$0xff] }
  0x5a   : > { %881 = vmatpush1.bf16.msra.mxu0 %v880_v7  ;;  %s1135_s12 = smov 112   ;;  %s1136_s17 = smov 111   ;;  %v633_v29 = vld [vmem:[%s1608_s3 + $0x8] sm:$0xff]  ;;  %v1406_v48 = vsub.s32 0, %v409_v44  ;;  %v1408_v49 = vsub.s32 1, %v409_v44  ;;  %vm401_vm1 = vcmp.lt.s32.totalorder %v1402_v45, 17 }
  0x5b   : > { %869 = vmatprep.mubr.msk.f32.mxu1 %vm303_vm0, %v633_v29  ;;  %v637_v30 = vld [vmem:[%s1609_s4 + $0x8] sm:$0xff]  ;;  %vm430_vm2 = vcmp.lt.s32.totalorder %v1402_v45, 16  ;;  %vm460_vm3 = vcmp.lt.s32.totalorder %v1402_v45, 15  ;;  %vm490_vm4 = vcmp.lt.s32.totalorder %v1402_v45, 1  ;;  %vm520_vm5 = vcmp.lt.s32.totalorder %v1402_v45, 127  ;;  %s859_s8 = sshll.u32 %s1312_s16, 3 }
  0x5c   : > { %300 = vperm.xlu0 %989, %v292_v10   ;;  %v406_v50 = vld [vmem:[%s1610_s5] ss:$8 sm:$0x3]  ;;  %v862_v54 = vld [vmem:[%s1610_s5 + $0x1] ss:$8 sm:$0x3] }
  0x5d   : > { %860 = vmatmul.mubr.msk.f32.vlgmr.msra.gmra.mrb[0].mxu0 %vm303_vm0, %v289_v9  ;;  %v411_v53 = vrot.slane %v406_v50, %v1406_v48  ;;  %v415_v55 = vrot.slane %v406_v50, %v1408_v49  ;;  %v441_v60 = vrot.slane %v862_v54, %v1406_v48  ;;  %v445_v61 = vrot.slane %v862_v54, %v1408_v49  ;;  %v863_v1 = vld [vmem:[%s1610_s5 + $0x2] ss:$8 sm:$0x3]  ;;  %s877_s15 = sshll.u32 %s1194_s25, 7  ;;  %s284_s29 = scalar_lea.vmem [#allocation7], %s859_s8 }
  0x5e   : > { %380 = vmatprep.mubr.f32.mxu0 %v1127_v0  ;;  %vm550_vm6 = vcmp.lt.s32.totalorder %v1402_v45, 113  ;;  %vm580_vm7 = vcmp.lt.s32.totalorder %v1402_v45, 112  ;;  %vm610_vm8 = vcmp.lt.s32.totalorder %v1402_v45, 111  ;;  %v635_v45 = vld [vmem:[%s1608_s3 + $0x18] sm:$0xff]  ;;  %s769_s27 = sshll.u32 %s284_s29, 4  ;;  %s1137_s25 = smov [#allocation7]   ;;  %s1563_s27 = int_to_ptr.vmem [resolvable:$true] %s769_s27 }
  0x61   : > { %861 = vmatmul.mubr.msk.f32.gmra.mrb[2].mxu0 %vm303_vm0, %v290_v11  ;;  %v471_v11 = vrot.slane %v863_v1, %v1406_v48 }
  0xd7   : > { %v296_v12 = vpop.permute.xlu0 %295 }
  0xdb   : > { %v301_v17 = vpop.permute.xlu0 %300 }
 0x130   : > { %v376_v13 = vpop.f32.mrb[0].mxu0 }
 0x131   : > { %v377_v14 = vadd.f32 %v376_v13, %v296_v12  ;;  %v378_v15 = vpop.f32.mrb[1].mxu0 }
 0x132   : > { %v379_v18 = vadd.f32 %v378_v15, %v296_v12  ;;  %v475_v12 = vrot.slane %v863_v1, %v1408_v49 }
 0x133   : > { %v1332_v16 = vmax.f32 %v377_v14, 0.0 }
 0x134   : > { %v382_v19 = vpop.f32.mrb[2].mxu0  ;;  %v1339_v24 = vmax.f32 %v379_v18, 0.0  ;;  %v864_v18 = vld [vmem:[%s1610_s5 + $0x3] ss:$8 sm:$0x3] }
 0x135   : > { %v383_v20 = vadd.f32 %v382_v19, %v301_v17  ;;  %v384_v21 = vpop.f32.mrb[3].mxu0  ;;  %422 = vrot.lane.b32.xlu0 %v1332_v16, %s1129_s11  ;;  %391 = vrot.lane.b32.xlu1 %v1332_v16, %s1130_s20 }
 0x136   : > { %v385_v22 = vadd.f32 %v384_v21, %v301_v17 }
 0x137   : > { %v1337_v23 = vmax.f32 %v383_v20, 0.0 }
 0x138   : > { %v1341_v25 = vmax.f32 %v385_v22, 0.0 }
 0x139   : > { %452 = vrot.lane.b32.xlu0 %v1332_v16, %s1131_s18  ;;  %393 = vrot.lane.b32.xlu1 %v1337_v23, %s1130_s20  ;;  %v900_v26 = vpack.c.bf16 %v1337_v23, %v1332_v16 }
 0x13a   : > { %v898_v27 = vpack.c.bf16 %v1341_v25, %v1339_v24 }
 0x13d   : > { %482 = vrot.lane.b32.xlu0 %v1332_v16, %s1132_s7  ;;  %424 = vrot.lane.b32.xlu1 %v1337_v23, %s1129_s11 }
 0x141   : > { %512 = vrot.lane.b32.xlu0 %v1332_v16, %s1133_s30  ;;  %454 = vrot.lane.b32.xlu1 %v1337_v23, %s1131_s18 }
 0x145   : > { %542 = vrot.lane.b32.xlu0 %v1332_v16, %s1134_s26  ;;  %484 = vrot.lane.b32.xlu1 %v1337_v23, %s1132_s7 }
 0x149   : > { %572 = vrot.lane.b32.xlu0 %v1332_v16, %s1135_s12  ;;  %514 = vrot.lane.b32.xlu1 %v1337_v23, %s1133_s30 }
 0x14d   : > { %395 = vrot.lane.b32.xlu0 %v1339_v24, %s1130_s20  ;;  %544 = vrot.lane.b32.xlu1 %v1337_v23, %s1134_s26 }
 0x151   : > { %426 = vrot.lane.b32.xlu0 %v1339_v24, %s1129_s11  ;;  %574 = vrot.lane.b32.xlu1 %v1337_v23, %s1135_s12 }
 0x155   : > { %456 = vrot.lane.b32.xlu0 %v1339_v24, %s1131_s18  ;;  %397 = vrot.lane.b32.xlu1 %v1341_v25, %s1130_s20  ;;  %s755_s20 = scalar_lea.sflag [#allocation4], %s1312_s16 }
 0x159   : > { %486 = vrot.lane.b32.xlu0 %v1339_v24, %s1132_s7  ;;  %428 = vrot.lane.b32.xlu1 %v1341_v25, %s1129_s11  ;;  %s1561_s11 = scalar_lea.hbm %s1611_s6, %s877_s15 }
 0x15d   : > { %602 = vrot.lane.b32.xlu0 %v1332_v16, %s1136_s17  ;;  %458 = vrot.lane.b32.xlu1 %v1341_v25, %s1131_s18  ;;  %s1049_s18 = scalar_lea.vmem %s1563_s27, 128 }
 0x15e   : > { %p1050_p4 = scmp.ne.s32.totalorder %s1563_s27, %s1049_s18 }
 0x160   : > { %p1051_p6 = pnand %p1050_p4, %p1264_p12 }
 0x161   : > { %516 = vrot.lane.b32.xlu0 %v1339_v24, %s1133_s30  ;;  %488 = vrot.lane.b32.xlu1 %v1341_v25, %s1132_s7  ;;  %s1053_s7 = sshll.u32 %s1137_s25, 4  ;;  %s1054_s7 = int_to_ptr.vmem [resolvable:$false] %s1053_s7 }
 0x162   : > { %p1052_p8 = pneg %p1051_p6  ;;  %p1056_p10 = scmp.lt.s32.totalorder %s1563_s27, %s1054_s7 }
 0x165   : > { %546 = vrot.lane.b32.xlu0 %v1339_v24, %s1134_s26  ;;  %604 = vrot.lane.b32.xlu1 %v1337_v23, %s1136_s17  ;;  %v868_v23 = vld [vmem:[%s1610_s5 + $0x7] ss:$8 sm:$0x3] }
 0x169   : > { %576 = vrot.lane.b32.xlu0 %v1339_v24, %s1135_s12  ;;  %518 = vrot.lane.b32.xlu1 %v1341_v25, %s1133_s30  ;;  %s1055_s30 = scalar_lea.vmem %s1054_s7, 256 }
 0x16a   : > { %p1057_p13 = scmp.lt.s32.totalorder %s1055_s30, %s1049_s18 }
 0x16c   : > { %p1058_p3 = por %p1057_p13, %p1056_p10 }
 0x16d   : > { %606 = vrot.lane.b32.xlu0 %v1339_v24, %s1136_s17  ;;  %548 = vrot.lane.b32.xlu1 %v1341_v25, %s1134_s26  ;;  %v867_v24 = vld [vmem:[%s1610_s5 + $0x6] ss:$8 sm:$0x3] }
 0x16e   : > { %p1059_p7 = pnand %p1058_p3, %p1052_p8 }
 0x171   : > { %640 = vperm.xlu0 %989, %v636_v28   ;;  %578 = vrot.lane.b32.xlu1 %v1341_v25, %s1135_s12 }
 0x175   : > { %608 = vrot.lane.b32.xlu1 %v1341_v25, %s1136_s17 }
 0x179   : > { %645 = vperm.xlu1 %990, %v637_v30  }
 0x1a7   : > { %v423_v31 = vpop.permute.xlu0 %422  ;;  %v392_v32 = vpop.permute.xlu1 %391 }
 0x1ab   : > { %v453_v33 = vpop.permute.xlu0 %452  ;;  %v394_v34 = vpop.permute.xlu1 %393 }
 0x1af   : > { %v1390_v35 = vpop.permute.xlu0 %482  ;;  %v425_v36 = vpop.permute.xlu1 %424 }
 0x1b3   : > { %v1392_v37 = vpop.permute.xlu0 %512  ;;  %v455_v38 = vpop.permute.xlu1 %454 }
 0x1b7   : > { %v1394_v39 = vpop.permute.xlu0 %542  ;;  %v1396_v40 = vpop.permute.xlu1 %484 }
 0x1bb   : > { %v1398_v42 = vpop.permute.xlu0 %572  ;;  %v1400_v43 = vpop.permute.xlu1 %514 }
 0x1bf   : > { %v396_v46 = vpop.permute.xlu0 %395  ;;  %v1404_v47 = vpop.permute.xlu1 %544 }
 0x1c0   : > { %v402_v56 = vsel %vm401_vm1, %v392_v32, %v396_v46  ;;  %v404_v57 = vsel %vm401_vm1, %v396_v46, %v392_v32  ;;  %v501_v32 = vrot.slane %v864_v18, %v1406_v48 }
 0x1c1   : > { %v418_v0 = vmul.f32 %v411_v53, %v404_v57  ;;  %v419_v3 = vmul.f32 %v415_v55, %v402_v56 }
 0x1c3   : > { %v427_v51 = vpop.permute.xlu0 %426  ;;  %v1414_v52 = vpop.permute.xlu1 %574 }
 0x1c4   : > { %v431_v5 = vsel %vm430_vm2, %v423_v31, %v427_v51  ;;  %v433_v6 = vsel %vm430_vm2, %v427_v51, %v423_v31 }
 0x1c5   : > { %v448_v15 = vmul.f32 %v441_v60, %v433_v6  ;;  %v449_v17 = vmul.f32 %v445_v61, %v431_v5 }
 0x1c7   : > { %v457_v58 = vpop.permute.xlu0 %456  ;;  %v398_v59 = vpop.permute.xlu1 %397 }
 0x1c8   : > { %v403_v62 = vsel %vm401_vm1, %v394_v34, %v398_v59  ;;  %v405_v63 = vsel %vm401_vm1, %v398_v59, %v394_v34  ;;  %v461_v21 = vsel %vm460_vm3, %v453_v33, %v457_v58  ;;  %v463_v22 = vsel %vm460_vm3, %v457_v58, %v453_v33 }
 0x1c9   : > { %v420_v2 = vmul.f32 %v411_v53, %v405_v63  ;;  %v421_v4 = vmul.f32 %v415_v55, %v403_v62  ;;  %v505_v34 = vrot.slane %v864_v18, %v1408_v49  ;;  %v478_v44 = vmul.f32 %v471_v11, %v463_v22 }
 0x1ca   : > { %v479_v33 = vmul.f32 %v475_v12, %v461_v21 }
 0x1cb   : > { %v487_v7 = vpop.permute.xlu0 %486  ;;  %v429_v8 = vpop.permute.xlu1 %428  ;;  %v882_v9 = vpack.c.bf16 %v421_v4, %v419_v3  ;;  %v884_v10 = vpack.c.bf16 %v420_v2, %v418_v0  ;;  %v866_v4 = vld [vmem:[%s1610_s5 + $0x5] ss:$8 sm:$0x3] }
 0x1cc   : > { %v432_v13 = vsel %vm430_vm2, %v425_v36, %v429_v8  ;;  %v434_v14 = vsel %vm430_vm2, %v429_v8, %v425_v36  ;;  %v491_v51 = vsel %vm490_vm4, %v1390_v35, %v487_v7  ;;  %v493_v53 = vsel %vm490_vm4, %v487_v7, %v1390_v35  ;;  %v865_v35 = vld [vmem:[%s1610_s5 + $0x4] ss:$8 sm:$0x3] }
 0x1cd   : > { %v450_v19 = vmul.f32 %v441_v60, %v434_v14  ;;  %v451_v20 = vmul.f32 %v445_v61, %v432_v13  ;;  %883 = vmatprep.subr.bf16.mxu1 %v882_v9  ;;  %v508_v59 = vmul.f32 %v501_v32, %v493_v53  ;;  %v509_v60 = vmul.f32 %v505_v34, %v491_v51 }
 0x1ce   : > { %885 = vmatpush1.bf16.msra.mxu1 %v884_v10  ;;  %v531_v3 = vrot.slane %v865_v35, %v1406_v48  ;;  %v561_v8 = vrot.slane %v866_v4, %v1406_v48  ;;  %v565_v9 = vrot.slane %v866_v4, %v1408_v49 }
 0x1cf   : > { %v1446_v28 = vpop.permute.xlu0 %602  ;;  %v459_v29 = vpop.permute.xlu1 %458  ;;  %v886_v30 = vpack.c.bf16 %v451_v20, %v449_v17  ;;  %v888_v31 = vpack.c.bf16 %v450_v19, %v448_v15  ;;  %v591_v19 = vrot.slane %v867_v24, %v1406_v48  ;;  %v595_v20 = vrot.slane %v867_v24, %v1408_v49 }
 0x1d0   : > { %v462_v36 = vsel %vm460_vm3, %v455_v38, %v459_v29  ;;  %v464_v41 = vsel %vm460_vm3, %v459_v29, %v455_v38 }
 0x1d1   : > { %v480_v46 = vmul.f32 %v471_v11, %v464_v41  ;;  %v481_v50 = vmul.f32 %v475_v12, %v462_v36  ;;  %887 = vmatprep.subr.bf16.mxu1 %v886_v30  ;;  %v621_v41 = vrot.slane %v868_v23, %v1406_v48 }
 0x1d2   : > { %889 = vmatpush1.bf16.msra.mxu1 %v888_v31 }
 0x1d3   : > { %v517_v54 = vpop.permute.xlu0 %516  ;;  %v489_v55 = vpop.permute.xlu1 %488  ;;  %v890_v56 = vpack.c.bf16 %v481_v50, %v479_v33  ;;  %v892_v57 = vpack.c.bf16 %v480_v46, %v478_v44  ;;  %v625_v44 = vrot.slane %v868_v23, %v1408_v49 }
 0x1d4   : > { %v492_v38 = vsel %vm490_vm4, %v1396_v40, %v489_v55  ;;  %v494_v58 = vsel %vm490_vm4, %v489_v55, %v1396_v40  ;;  %v535_v40 = vrot.slane %v865_v35, %v1408_v49  ;;  %v521_v5 = vsel %vm520_vm5, %v1392_v37, %v517_v54  ;;  %v634_v35 = vld [vmem:[%s1608_s3 + $0x10] sm:$0xff] }
 0x1d5   : > { %v510_v61 = vmul.f32 %v501_v32, %v494_v58  ;;  %v511_v62 = vmul.f32 %v505_v34, %v492_v38  ;;  %891 = vmatprep.subr.bf16.mxu1 %v890_v56  ;;  %v523_v6 = vsel %vm520_vm5, %v517_v54, %v1392_v37  ;;  %v538_v11 = vmul.f32 %v531_v3, %v521_v5 }
 0x1d6   : > { %893 = vmatpush1.bf16.msra.mxu1 %v892_v57  ;;  %v539_v12 = vmul.f32 %v535_v40, %v523_v6 }
 0x1d7   : > { %v547_v63 = vpop.permute.xlu0 %546  ;;  %v1470_v0 = vpop.permute.xlu1 %604  ;;  %v894_v1 = vpack.c.bf16 %v511_v62, %v509_v60  ;;  %v896_v2 = vpack.c.bf16 %v510_v61, %v508_v59  ;;  %v632_v62 = vld [vmem:[%s1608_s3] sm:$0xff] }
 0x1d8   : > { %v551_v14 = vsel %vm550_vm6, %v1394_v39, %v547_v63  ;;  %v553_v15 = vsel %vm550_vm6, %v547_v63, %v1394_v39 }
 0x1d9   : > { %895 = vmatprep.subr.bf16.mxu1 %v894_v1  ;;  %v568_v22 = vmul.f32 %v561_v8, %v551_v14  ;;  %v569_v16 = vmul.f32 %v565_v9, %v553_v15 }
 0x1da   : > { %897 = vmatpush1.bf16.msra.mxu1 %v896_v2 }
 0x1db   : > { %899 = vmatprep.subr.bf16.mxu1 %v898_v27  ;;  %v519_v7 = vpop.permute.xlu1 %518  ;;  %v577_v25 = vpop.permute.xlu0 %576 }
 0x1dc   : > { %v522_v10 = vsel %vm520_vm5, %v1400_v43, %v519_v7  ;;  %v524_v37 = vsel %vm520_vm5, %v519_v7, %v1400_v43  ;;  %v581_v30 = vsel %vm580_vm7, %v1398_v42, %v577_v25  ;;  %v583_v31 = vsel %vm580_vm7, %v577_v25, %v1398_v42 }
 0x1dd   : > { %v540_v27 = vmul.f32 %v531_v3, %v522_v10  ;;  %v541_v13 = vmul.f32 %v535_v40, %v524_v37  ;;  %v598_v42 = vmul.f32 %v591_v19, %v581_v30  ;;  %v599_v50 = vmul.f32 %v595_v20, %v583_v31 }
 0x1de   : > { %901 = vmatpush1.bf16.msra.mxu1 %v900_v26 }
 0x1df   : > { %v549_v43 = vpop.permute.xlu1 %548  ;;  %v902_v17 = vpack.c.bf16 %v541_v13, %v539_v12  ;;  %v904_v18 = vpack.c.bf16 %v540_v27, %v538_v11 }
 0x1e0   : > { %v552_v21 = vsel %vm550_vm6, %v1404_v47, %v549_v43  ;;  %v554_v39 = vsel %vm550_vm6, %v549_v43, %v1404_v47  ;;  %v607_v47 = vpop.permute.xlu0 %606 }
 0x1e1   : > { %v570_v26 = vmul.f32 %v561_v8, %v552_v21  ;;  %v571_v29 = vmul.f32 %v565_v9, %v554_v39  ;;  %903 = vmatprep.subr.bf16.mxu1 %v902_v17  ;;  %v611_v54 = vsel %vm610_vm8, %v1446_v28, %v607_v47  ;;  %v613_v48 = vsel %vm610_vm8, %v607_v47, %v1446_v28 }
 0x1e2   : > { %905 = vmatpush1.bf16.msra.mxu1 %v904_v18  ;;  %v628_v38 = vmul.f32 %v621_v41, %v611_v54  ;;  %v629_v58 = vmul.f32 %v625_v44, %v613_v48 }
 0x1e3   : > { %v579_v32 = vpop.permute.xlu1 %578  ;;  %v906_v34 = vpack.c.bf16 %v571_v29, %v569_v16  ;;  %v908_v36 = vpack.c.bf16 %v570_v26, %v568_v22 }
 0x1e4   : > { %v582_v33 = vsel %vm580_vm7, %v1414_v52, %v579_v32  ;;  %v584_v46 = vsel %vm580_vm7, %v579_v32, %v1414_v52 }
 0x1e5   : > { %v600_v51 = vmul.f32 %v591_v19, %v582_v33  ;;  %v601_v53 = vmul.f32 %v595_v20, %v584_v46  ;;  %907 = vmatprep.subr.bf16.mxu1 %v906_v34 }
 0x1e6   : > { %909 = vmatpush1.bf16.msra.mxu1 %v908_v36 }
 0x1e7   : > { %v609_v49 = vpop.permute.xlu1 %608  ;;  %v910_v55 = vpack.c.bf16 %v601_v53, %v599_v50  ;;  %v912_v56 = vpack.c.bf16 %v600_v51, %v598_v42 }
 0x1e8   : > { %v612_v52 = vsel %vm610_vm8, %v1470_v0, %v609_v49  ;;  %v614_v57 = vsel %vm610_vm8, %v609_v49, %v1470_v0 }
 0x1e9   : > { %v630_v59 = vmul.f32 %v621_v41, %v612_v52  ;;  %v631_v60 = vmul.f32 %v625_v44, %v614_v57  ;;  %911 = vmatprep.subr.bf16.mxu1 %v910_v55 }
 0x1ea   : > { %913 = vmatpush1.bf16.msra.mxu1 %v912_v56 }
 0x1eb   : > { %v914_v61 = vpack.c.bf16 %v631_v60, %v629_v58  ;;  %v916_v28 = vpack.c.bf16 %v630_v59, %v628_v38 }
 0x1ed   : > { %915 = vmatprep.subr.bf16.mxu1 %v914_v61 }
 0x1ee   : > { %917 = vmatpush1.bf16.msra.mxu1 %v916_v28 }
 0x1f0   : > { %v641_v63 = vpop.permute.xlu0 %640 }
 0x1f1   : > { %719 = vmatmul.mubr.f32.vlgmr.msra.gmra.mrb[0].mxu1 %v632_v62 }
 0x1f2   : > { %870 = vmatprep.mubr.msk.f32.mxu1 %vm303_vm0, %v635_v45 }
 0x1f5   : > { %725 = vmatmul.mubr.f32.gmra.mrb[2].mxu1 %v634_v35 }
 0x1f8   : > { %v646_v40 = vpop.permute.xlu1 %645 }
 0x2c4   : > { %v720_v0 = vpop.f32.mrb[0].mxu1 }
 0x2c5   : > { %v721_v1 = vadd.f32 %v720_v0, %v641_v63  ;;  %v722_v2 = vpop.f32.mrb[1].mxu1 }
 0x2c6   : > { %v723_v3 = vadd.f32 %v722_v2, %v641_v63 }
 0x2c7   : > { %v733_v5 = vrot.slane %v721_v1, 4 }
 0x2c8   : > { %v726_v4 = vpop.f32.mrb[2].mxu1  ;;  %v734_v8 = vrot.slane %v723_v3, 4 }
 0x2c9   : > { %v727_v6 = vadd.f32 %v726_v4, %v646_v40  ;;  %v728_v7 = vpop.f32.mrb[3].mxu1  ;;  %v737_v11 = vmax.f32 %v721_v1, %v733_v5 }
 0x2ca   : > { %v729_v9 = vadd.f32 %v728_v7, %v646_v40  ;;  %v738_v24 = vmax.f32 %v723_v3, %v734_v8 }
 0x2cb   : > { %v741_v10 = vrot.slane %v727_v6, 4 }
 0x2cc   : > { %v742_v37 = vrot.slane %v729_v9, 4 }
 0x2cd   : > { %v745_v12 = vmax.f32 %v727_v6, %v741_v10 }
 0x2ce   : > { %v746_v25 = vmax.f32 %v729_v9, %v742_v37 }
 0x2cf   : > { %v747_v27 = vmax.f32 %v737_v11, %v745_v12 }
 0x2d0   : > { %v748_v13 = vmax.f32 %v738_v24, %v746_v25 }
 0x2d2   : > { %v751_v14 = vcombine.low %v747_v27, %v748_v13 }
 0x2d4   : > { %753 = vst [vmem:[%s284_s29] sm:$0xff] %v751_v14 }
 0x2d5   : > { %1062 = shalt.err (!%p1059_p7)
}
 0x2d6   : > { %s1063_s16 = scalar_lea.hbm %s1561_s11, 128  ;;  %s1067_s17 = scalar_lea.hbm %s1611_s6, 256 }
 0x2d7   : > { %p1064_p9 = scmp.ne.s32.totalorder %s1561_s11, %s1063_s16  ;;  %p1068_p5 = scmp.lt.u32.totalorder %s1561_s11, %s1611_s6 }
 0x2d8   : > { %p1069_p1 = scmp.lt.u32.totalorder %s1067_s17, %s1063_s16  ;;  %p1071_p4 = scmp.lt.u32.totalorder %s1063_s16, %s1561_s11 }
 0x2d9   : > { %p1065_p2 = pnand %p1064_p9, %p1264_p12 }
 0x2da   : > { %p1070_p11 = por %p1069_p1, %p1068_p5 }
 0x2db   : > { %p1066_p0 = pneg %p1065_p2 }
 0x2dc   : > { %p1072_p6 = por %p1071_p4, %p1070_p11 }
 0x2de   : > { %p1073_p8 = pnand %p1072_p6, %p1066_p0 }
 0x2e0   : > { %1076 = shalt.err (!%p1073_p8)
}
 0x2e1   : > { %924 = dma.vmem_to_hbm [thread:$0]  (%p1264_p12), %s1563_s27, 128, %s1561_s11, %s755_s20  }
 0x2e2 PF: > { %s781_s29 = sand.u32 1, %s1107_s21   ;;  %p1626_p10 = scmp.ne.s32.totalorder %s1616_s28, 0 }
 0x2e3   : > { %p1627_p13 = scmp.ge.s32.totalorder %s1119_s24, 2  ;;  %s782_s19 = scalar_lea.sflag [#allocation4], %s781_s29 }
 0x2e5   : > { %p935_p3 = pnand %p1627_p13, %p1626_p10 }
 0x2e7   : > { %1102 = dma.done.wait (!%p935_p3), %s782_s19, 128  }
 0x2e8   : > { %1104 = vsyncadd (!%p935_p3), %s782_s19, 4294967168  ;;  %p20_p7 = scmp.ge.s32.totalorder %s1229_s9, 4   ;;  %s1628_s21 = smov %s1111_s22 }
 0x2e9   : > { %s1629_s22 = smov %s1115_s23  ;;  %s1630_s23 = smov %s1260_s13 }
 0x2ea   : > { %s1631_s24 = smov %s1229_s9  ;;  %22 = sbr.rel (!%p20_p7) target bundleno = 6 (0x6), region = 100 }
 0x2f1   :  { %787 = vsyncpa [#allocation3], 1 }
 0x2f2   :  { %789 = vsyncpa [#allocation3 + $0x1], 1 }
 0x2f3   :  { %790 = vsyncpa [#allocation6], 1 }
 0x2f4   :  { %791 = vsyncpa [#allocation4], 1 }
 0x2f5   :  { %793 = vsyncpa [#allocation4 + $0x1], 1 }

</bundles_post_ra>
